<compile_context>
chip_gen: v5e
topology: v5e:2x2
jax: 0.10.0
libtpu: 0.0.40
codegen_flags: <defaults>
</compile_context>

<pallas_src>
import jax
import jax.numpy as jnp
from jax.experimental import pallas as pl
from jax.experimental.pallas import tpu as pltpu


# Conservative resident-bytes budget: well under the scoped-VMEM limit we set
# below (32 MiB), which itself is safe on v5e/v6e (128 MiB) and v7x (64 MiB).
_VMEM_BUDGET_BYTES = 24 * 1024 * 1024
_VMEM_LIMIT_BYTES = 32 * 1024 * 1024


def _shape_pred_kernel(feat_ref, w_ref, params_ref, out_ref):
    # feat_ref:   (B, K)  f32  -- whole batch resident (BN stats need full B)
    # w_ref:      (K, TN) bf16 -- one lane-dense N tile of the weight
    # params_ref: (8, TN) f32  -- row 0 = gamma, row 1 = beta (padded cols = 0)
    x = feat_ref[...].astype(jnp.bfloat16)          # cast in-kernel (VPU, free-ish)
    w = w_ref[...]

    # Linear (bias omitted: exactly cancelled by batch-stat BN mean subtraction).
    y = jnp.dot(x, w, preferred_element_type=jnp.float32)   # (B, TN) f32 acc

    # BatchNorm1d, training-mode batch statistics, single-pass moments,
    # folded into one affine.  All accumulation in f32.
    inv_b = 1.0 / y.shape[0]
    s = jnp.sum(y, axis=0, keepdims=True)            # (1, TN)
    ss = jnp.sum(y * y, axis=0, keepdims=True)       # (1, TN)
    mean = s * inv_b
    var = jnp.maximum(ss * inv_b - mean * mean, 0.0)  # guard tiny negatives

    gamma = params_ref[0:1, :]                       # (1, TN)
    beta = params_ref[1:2, :]                        # (1, TN)
    scale = gamma * jax.lax.rsqrt(var + 1e-5)        # EUP rsqrt
    shift = beta - mean * scale
    y_bn = y * scale + shift

    # LeakyReLU(0.2): max(y, 0.2*y) == leaky_relu for slope in (0, 1).
    out_ref[...] = jnp.maximum(y_bn, 0.2 * y_bn)

    # TODO(synk): pred_voxels=True applies sigmoid(self.decoder(shape)), but the
    # voxel decoder is attached externally via add_voxel_decoder() and is not
    # part of this module's definition, so it is not implemented here.
    # TODO(synk): eval-mode BatchNorm (running_mean/var, momentum updates) is
    # not implemented; training-mode batch statistics only.


def init_shape_predictor_params(w, b, gamma, beta):
    """One-time packing of parameters.  Call at parameter-init time, NOT per
    forward: this is the hoisted pad/pack/cast work.

    Returns (w_packed bf16 (K, N_pad), params_packed f32 (8, N_pad), N)."""
    del b  # Linear bias is exactly cancelled by batch-stat BN; see kernel.
    K, N = w.shape
    n_pad = max(128, ((N + 127) // 128) * 128)       # lane-dense output width
    pad_cols = n_pad - N

    # Weight: pad columns with zeros (padded y columns become exactly 0),
    # store in bf16 for the MXU (halves the dominant W DMA).
    w_packed = jnp.pad(w.astype(jnp.float32), ((0, 0), (0, pad_cols)))
    w_packed = w_packed.astype(jnp.bfloat16)

    # gamma/beta packed into one (8, N_pad) f32 array (rows 0..1).  Padded
    # gamma columns are 0 so padded outputs stay exactly 0 (no NaNs: padded
    # var=0 -> rsqrt(eps) finite, times gamma=0 -> 0).
    params = jnp.zeros((8, n_pad), jnp.float32)
    params = params.at[0, :N].set(gamma.reshape(-1).astype(jnp.float32))
    params = params.at[1, :N].set(beta.reshape(-1).astype(jnp.float32))
    return w_packed, params, N


def shape_predictor_forward(feat, w_packed, params_packed):
    """feat (B, K) f32, prepacked params -> lane-padded (B, N_pad) f32 output.

    The real features are columns [:N]; padding columns are exact zeros.  The
    padded buffer is returned as-is (no post-call slice) so a downstream
    consumer (e.g. the voxel decoder) can take the lane-dense layout directly.
    """
    B, K = feat.shape
    Kw, n_pad = w_packed.shape
    assert Kw == K and n_pad % 128 == 0
    if feat.dtype != jnp.float32:
        feat = feat.astype(jnp.float32)

    # Resident bytes per grid step (x2 for double-buffering headroom).
    def footprint(tn):
        return 2 * (B * K * 4 + K * tn * 2 + 8 * tn * 4 + B * tn * 4)

    # Single grid step whenever it fits; otherwise tile N (128 always divides).
    if footprint(n_pad) <= _VMEM_BUDGET_BYTES:
        tn = n_pad
    else:
        tn = 128
        for cand in (2048, 1024, 512, 256):
            if n_pad % cand == 0 and footprint(cand) <= _VMEM_BUDGET_BYTES:
                tn = cand
                break
    if footprint(tn) > _VMEM_BUDGET_BYTES:
        # TODO(synk): for very large B, restructure BN as a two-pass reduction
        # over B tiles ((1, tn) scratch accumulators, "arbitrary" B grid axis)
        # instead of keeping the whole batch resident.
        raise NotImplementedError(
            "batch too large for whole-batch-resident BN kernel")

    n_tiles = n_pad // tn
    # Megacore split only pays off with several independent N tiles (v7x);
    # with 1 tile it would just duplicate the feat DMA / startup cost.
    semantics = ("parallel",) if n_tiles >= 4 else ("arbitrary",)

    cost = pl.CostEstimate(
        flops=2 * B * K * n_pad + 10 * B * n_pad,
        transcendentals=n_pad,                        # rsqrt per feature
        bytes_accessed=B * K * 4 + K * n_pad * 2 + 8 * n_pad * 4 + B * n_pad * 4,
    )

    return pl.pallas_call(
        _shape_pred_kernel,
        out_shape=jax.ShapeDtypeStruct((B, n_pad), jnp.float32),
        grid=(n_tiles,),
        in_specs=[
            # Whole batch / whole K resident every step: BN statistics must be
            # computed over the full batch axis (tiling N is safe, B is not).
            pl.BlockSpec((B, K), lambda j: (0, 0)),
            pl.BlockSpec((K, tn), lambda j: (0, j)),
            pl.BlockSpec((8, tn), lambda j: (0, j)),
        ],
        out_specs=pl.BlockSpec((B, tn), lambda j: (0, j)),
        compiler_params=pltpu.CompilerParams(
            dimension_semantics=semantics,
            vmem_limit_bytes=_VMEM_LIMIT_BYTES),
        cost_estimate=cost,
    )(feat, w_packed, params_packed)


def _reference_forward(feat, w, b, gamma, beta, matmul_dtype=jnp.float32):
    """Pure-JAX reference: Linear(+bias) -> BatchNorm1d(batch stats) -> LeakyReLU.
    matmul_dtype lets us also build a precision-matched (bf16-matmul) reference."""
    y = jnp.dot(feat.astype(matmul_dtype), w.astype(matmul_dtype),
                preferred_element_type=jnp.float32)
    y = y + b.reshape(1, -1).astype(jnp.float32)
    mean = jnp.mean(y, axis=0, keepdims=True)
    var = jnp.mean((y - mean) ** 2, axis=0, keepdims=True)
    y = (y - mean) * jax.lax.rsqrt(var + 1e-5)
    y = y * gamma.reshape(1, -1) + beta.reshape(1, -1)
    return jnp.where(y >= 0.0, y, 0.2 * y)


if __name__ == "__main__":
    # Small shapes consistent with the module: feat (B, nz_feat) -> (B, nz_shape)
    B, nz_feat, nz_shape = 8, 32, 16

    key = jax.random.PRNGKey(0)
    k_feat, k_w, k_b, k_g, k_beta = jax.random.split(key, 5)

    feat = jax.random.normal(k_feat, (B, nz_feat), dtype=jnp.float32)

    # Deterministic parameter init (nn.Linear default-style scale, BN affine).
    bound = 1.0 / jnp.sqrt(jnp.float32(nz_feat))
    w = jax.random.uniform(k_w, (nz_feat, nz_shape), jnp.float32, -bound, bound)
    b = jax.random.uniform(k_b, (nz_shape,), jnp.float32, -bound, bound)
    gamma = 1.0 + 0.1 * jax.random.normal(k_g, (nz_shape,), dtype=jnp.float32)
    beta = 0.1 * jax.random.normal(k_beta, (nz_shape,), dtype=jnp.float32)

    # One-time packing (hoisted out of the per-call hot path).
    w_packed, params_packed, N = init_shape_predictor_params(w, b, gamma, beta)

    out_padded = shape_predictor_forward(feat, w_packed, params_packed)
    out_padded = jax.block_until_ready(out_padded)

    # Slice here only for the correctness check; downstream consumers keep the
    # padded lane-dense layout.
    out = out_padded[:, :N]
    assert out_padded.shape == (B, 128)
    assert out.shape == (B, nz_shape)

    # 1) Tight check vs a precision-matched reference (bf16 matmul inputs,
    #    f32 accumulation / BN math), verifying kernel math incl. the exact
    #    bias-cancellation under batch-stat BN.
    ref_bf16 = _reference_forward(feat, w, b, gamma, beta,
                                  matmul_dtype=jnp.bfloat16)
    err_matched = float(jnp.max(jnp.abs(out - ref_bf16)))
    assert err_matched < 1e-3, err_matched

    # 2) Loose check vs the full-f32 module semantics (bf16 matmul rounding
    #    only; BN renormalizes so the impact stays small).
    ref_f32 = _reference_forward(feat, w, b, gamma, beta,
                                 matmul_dtype=jnp.float32)
    err_f32 = float(jnp.max(jnp.abs(out - ref_f32)))
    assert err_f32 < 5e-2, err_f32

    # Padded columns must be exact zeros (no NaN leakage).
    assert float(jnp.max(jnp.abs(out_padded[:, N:]))) == 0.0

    print("KERNEL_OK")
</pallas_src>

<mosaic_0001>
module attributes {stable_mosaic.version = 11 : i64} {
  func.func @_shape_pred_kernel(%arg0: i32, %arg1: memref<8x32xf32, #tpu.memory_space<vmem>>, %arg2: memref<32x128xbf16, #tpu.memory_space<vmem>>, %arg3: memref<8x128xf32, #tpu.memory_space<vmem>>, %arg4: memref<8x128xf32, #tpu.memory_space<vmem>>) attributes {dimension_semantics = [#tpu.dimension_semantics<arbitrary>], iteration_bounds = array<i64: 1>, scalar_prefetch = 0 : i64, scratch_operands = 0 : i64, tpu.core_type = #tpu.core_type<tc>, window_params = [{pipeline_mode = #tpu.pipeline_mode<synchronous>, transform_indices = @transform_0, window_bounds = array<i64: 8, 32>}, {transform_indices = @transform_1, window_bounds = array<i64: 32, 128>}, {transform_indices = @transform_2, window_bounds = array<i64: 8, 128>}, {transform_indices = @transform_3, window_bounds = array<i64: 8, 128>}]} {
    %c0 = arith.constant 0 : index
    %c0_0 = arith.constant 0 : index
    %0 = vector.load %arg1[%c0, %c0_0] : memref<8x32xf32, #tpu.memory_space<vmem>>, vector<8x32xf32>
    %1 = arith.truncf %0 : vector<8x32xf32> to vector<8x32xbf16>
    %c0_1 = arith.constant 0 : index
    %c0_2 = arith.constant 0 : index
    %2 = vector.load %arg2[%c0_1, %c0_2] : memref<32x128xbf16, #tpu.memory_space<vmem>>, vector<32x128xbf16>
    %cst = arith.constant dense<0.000000e+00> : vector<8x128xf32>
    %3 = tpu.matmul %1, %2, %cst {dimension_numbers = #tpu.dot_dimension_numbers<[1], [0], [0], [1], [0, 0, 1, 1], [], []>} : vector<8x32xbf16>, vector<32x128xbf16>, vector<8x128xf32> -> vector<8x128xf32>
    %cst_3 = arith.constant dense<0.000000e+00> : vector<128xf32>
    %4 = vector.multi_reduction <add>, %3, %cst_3 [0] : vector<8x128xf32> to vector<128xf32>
    %5 = vector.shape_cast %4 : vector<128xf32> to vector<1x128xf32>
    %6 = arith.mulf %3, %3 : vector<8x128xf32>
    %cst_4 = arith.constant dense<0.000000e+00> : vector<128xf32>
    %7 = vector.multi_reduction <add>, %6, %cst_4 [0] : vector<8x128xf32> to vector<128xf32>
    %8 = vector.shape_cast %7 : vector<128xf32> to vector<1x128xf32>
    %cst_5 = arith.constant 1.250000e-01 : f32
    %9 = vector.broadcast %cst_5 : f32 to vector<1x128xf32>
    %10 = arith.mulf %5, %9 : vector<1x128xf32>
    %cst_6 = arith.constant 1.250000e-01 : f32
    %11 = vector.broadcast %cst_6 : f32 to vector<1x128xf32>
    %12 = arith.mulf %8, %11 : vector<1x128xf32>
    %13 = arith.mulf %10, %10 : vector<1x128xf32>
    %14 = arith.subf %12, %13 : vector<1x128xf32>
    %cst_7 = arith.constant 0.000000e+00 : f32
    %15 = vector.broadcast %cst_7 : f32 to vector<1x128xf32>
    %16 = arith.maximumf %14, %15 : vector<1x128xf32>
    %c0_8 = arith.constant 0 : index
    %c0_9 = arith.constant 0 : index
    %17 = vector.load %arg3[%c0_8, %c0_9] : memref<8x128xf32, #tpu.memory_space<vmem>>, vector<1x128xf32>
    %c1 = arith.constant 1 : index
    %c0_10 = arith.constant 0 : index
    %18 = vector.load %arg3[%c1, %c0_10] : memref<8x128xf32, #tpu.memory_space<vmem>>, vector<1x128xf32>
    %cst_11 = arith.constant 9.99999974E-6 : f32
    %19 = vector.broadcast %cst_11 : f32 to vector<1x128xf32>
    %20 = arith.addf %16, %19 : vector<1x128xf32>
    %21 = math.rsqrt %20 : vector<1x128xf32>
    %22 = arith.mulf %17, %21 : vector<1x128xf32>
    %23 = arith.mulf %10, %22 : vector<1x128xf32>
    %24 = arith.subf %18, %23 : vector<1x128xf32>
    %25 = vector.broadcast %22 : vector<1x128xf32> to vector<8x128xf32>
    %26 = arith.mulf %3, %25 : vector<8x128xf32>
    %27 = vector.broadcast %24 : vector<1x128xf32> to vector<8x128xf32>
    %28 = arith.addf %26, %27 : vector<8x128xf32>
    %cst_12 = arith.constant 2.000000e-01 : f32
    %29 = vector.broadcast %cst_12 : f32 to vector<8x128xf32>
    %30 = arith.mulf %29, %28 : vector<8x128xf32>
    %31 = arith.maximumf %28, %30 : vector<8x128xf32>
    %c0_13 = arith.constant 0 : index
    %c0_14 = arith.constant 0 : index
    %32 = vector.load %arg4[%c0_13, %c0_14] : memref<8x128xf32, #tpu.memory_space<vmem>>, vector<8x128xf32>
    tpu.vector_store %arg4[%c0_13, %c0_14], %31 {strides = array<i32>} : memref<8x128xf32, #tpu.memory_space<vmem>>, vector<8x128xf32>,
    return
  }
  func.func @transform_0(%arg0: i32) -> (i32, i32) {
    %c0_i32 = arith.constant 0 : i32
    %c0_i32_0 = arith.constant 0 : i32
    %c0_i32_1 = arith.constant 0 : i32
    return %c0_i32, %c0_i32_0 : i32, i32
  }
  func.func @transform_1(%arg0: i32) -> (i32, i32) {
    %c0_i32 = arith.constant 0 : i32
    %c0_i32_0 = arith.constant 0 : i32
    return %c0_i32, %arg0 : i32, i32
  }
  func.func @transform_2(%arg0: i32) -> (i32, i32) {
    %c0_i32 = arith.constant 0 : i32
    %c0_i32_0 = arith.constant 0 : i32
    return %c0_i32, %arg0 : i32, i32
  }
  func.func @transform_3(%arg0: i32) -> (i32, i32) {
    %c0_i32 = arith.constant 0 : i32
    %c0_i32_0 = arith.constant 0 : i32
    return %c0_i32, %arg0 : i32, i32
  }
}

</mosaic_0001>

<bundles_post_ra>
// kernel: tpu_custom_call.1
= control target key start
LH: loop header
LB: loop body
LE: loop exit
PB: predicated region body
PF: predicated region fallthrough
CT: control target
= control target key end

     0   :  { %8 = vsyncpa [#allocation3], 0  ;;  %s312_s0 = inlined_call_operand.hbm [shape: f32[8,32], index: 0, kind: input, shape index: {}]   ;;  %s313_s1 = inlined_call_operand.hbm [shape: bf16[32,128], index: 1, kind: input, shape index: {}]   ;;  %s314_s2 = inlined_call_operand.hbm [shape: f32[8,128], index: 2, kind: input, shape index: {}]   ;;  %s315_s3 = inlined_call_operand.hbm [shape: f32[8,128], index: 3, kind: output, shape index: {}]  }
   0x1   :  { %9 = vsyncpa [#allocation6], 0  ;;  %s26_s14 = sshll.u32 %s313_s1, 4  ;;  %s27_s14 = int_to_ptr.hbm [resolvable:$true] %s26_s14 }
   0x2   :  { %10 = vsyncpa [#allocation4], 0  ;;  %s274_s15 = smov [#allocation5]   ;;  %s16_s19 = sshll.u32 %s312_s0, 4  ;;  %s17_s19 = int_to_ptr.hbm [resolvable:$true] %s16_s19 }
   0x3   :  { %s28_s16 = sshll.u32 %s274_s15, 4  ;;  %s275_s20 = smov 64   ;;  %s29_s16 = int_to_ptr.vmem [resolvable:$true] %s28_s16 }
   0x4   :  { %s276_s21 = smov 4   ;;  %s277_s22 = smov [#allocation2]  }
   0x5   :  { %34 = dma.hbm_to_vmem [thread:$0]  %s27_s14, 256, %s29_s16, [#allocation6], %s275_s20, %s275_s20, %s276_s21  }
   0x6   :  { %s18_s23 = sshll.u32 %s277_s22, 4  ;;  %s40_s26 = sshll.u32 %s314_s2, 4  ;;  %s19_s23 = int_to_ptr.vmem [resolvable:$true] %s18_s23  ;;  %s41_s26 = int_to_ptr.hbm [resolvable:$true] %s40_s26 }
   0x7   :  { %21 = dma.hbm_to_vmem [thread:$0]  %s17_s19, 128, %s19_s23, [#allocation3]  }
   0x8   :  { %s278_s1 = smov [#allocation7]  }
   0x9   :  { %s42_s27 = sshll.u32 %s278_s1, 4  ;;  %s43_s27 = int_to_ptr.vmem [resolvable:$true] %s42_s27 }
   0xa   :  { %45 = dma.hbm_to_vmem [thread:$0]  %s41_s26, 128, %s43_s27, [#allocation6]  }
   0xb   :  { %268 = dma.done.wait [#allocation3], 128  }
   0xc   :  { %269 = vsyncadd [#allocation3], 4294967168 }
   0xd   :  { %270 = dma.done.wait [#allocation6], 384  }
   0xe   :  { %271 = vsyncadd [#allocation6], 4294966912  ;;  %v163_v0 = vld [vmem:[#allocation5 + $0x8] sm:$0xff]  ;;  %v162_v1 = vld [vmem:[#allocation5] sm:$0xff]  ;;  %vm77_vm0 = vcmask 261120   ;;  %s279_s0 = smov [#allocation8]  }
   0xf   :  { %87 = vmatpush.bf16.msra.mxu0 %v163_v0  ;;  %v59_v2 = vld [vmem:[#allocation2] sm:$0xff]  ;;  %v112_v30 = vld [vmem:[#allocation7] sm:$0x1]  ;;  %v113_v34 = vld [vmem:[#allocation7 + $0x1] sm:$0x1]  ;;  %s140_s2 = sshll.u32 %s279_s0, 4  ;;  %s141_s2 = int_to_ptr.vmem [resolvable:$true] %s140_s2 }
  0x10   :  { %v60_v3 = vpack.c.bf16 %v59_v2, %v59_v2  ;;  %s142_s30 = sshll.u32 %s315_s3, 4  ;;  %s143_s30 = int_to_ptr.hbm [resolvable:$true] %s142_s30 }
  0x13   :  { %88 = vmatpush.bf16.msra.mxu0 %v162_v1 }
  0x16   :  { %161 = vmatmul.msk.bf16.vlgmr.msra.gmra.mxu0 %vm77_vm0, %v60_v3 }
  0x93   :  { %v90_v4 = vpop.f32.mrf.mxu0 }
  0x94   :  { %v94_v5 = vrot.slane %v90_v4, 4  ;;  %v100_v6 = vmul.f32 %v90_v4, %v90_v4 }
  0x96   :  { %v95_v7 = vadd.f32 %v94_v5, %v90_v4  ;;  %v101_v8 = vrot.slane %v100_v6, 4 }
  0x98   :  { %v96_v9 = vrot.slane %v95_v7, 2  ;;  %v102_v10 = vadd.f32 %v101_v8, %v100_v6 }
  0x9a   :  { %v97_v11 = vadd.f32 %v96_v9, %v95_v7  ;;  %v103_v12 = vrot.slane %v102_v10, 2 }
  0x9b   :  { %v92_v13 = vpop.f32.mrf.mxu0 }
  0x9c   :  { %v98_v14 = vrot.slane %v97_v11, 1  ;;  %v104_v15 = vadd.f32 %v103_v12, %v102_v10 }
  0x9e   :  { %v99_v16 = vadd.f32 %v98_v14, %v97_v11  ;;  %v105_v17 = vrot.slane %v104_v15, 1 }
  0xa0   :  { %v106_v18 = vadd.f32 %v105_v17, %v104_v15  ;;  %v107_v19 = vmul.f32 0.125, %v99_v16 }
  0xa2   :  { %v108_v20 = vmul.f32 0.125, %v106_v18  ;;  %v109_v21 = vmul.f32 %v107_v19, %v107_v19 }
  0xa4   :  { %v110_v22 = vsub.f32 %v108_v20, %v109_v21 }
  0xa6   :  { %v111_v23 = vmax.f32 %v110_v22, 0.0 }
  0xa8   :  { %v114_v24 = vadd.f32 1e-05, %v111_v23 }
  0xaa   :  { %170 = vrsqrt.f32 %v114_v24  ;;  %vm121_vm2 = vweird.f32 %v114_v24 }
  0xb0   :  { %v171_v25 = vpop.eup %170 }
  0xb1   :  { %v116_v26 = vmul.f32 %v171_v25, %v114_v24  ;;  %vm122_vm1 = vweird.f32 %v171_v25 }
  0xb2   :  { %vm123_vm3 = vmor %vm121_vm2, %vm122_vm1 }
  0xb3   :  { %v117_v27 = vmul.f32 %v171_v25, %v116_v26 }
  0xb5   :  { %v118_v28 = vmul.f32 0.5, %v117_v27 }
  0xb7   :  { %v119_v29 = vsub.f32 1.5, %v118_v28 }
  0xb9   :  { %v120_v31 = vmul.f32 %v171_v25, %v119_v29 }
  0xbb   :  { %v124_v32 = vsel %vm123_vm3, %v171_v25, %v120_v31 }
  0xbc   :  { %v125_v33 = vmul.f32 %v124_v32, %v112_v30 }
  0xbe   :  { %v126_v35 = vmul.f32 %v125_v33, %v107_v19  ;;  %v128_v36 = vperm.slane %v125_v33, 0 }
  0xc0   :  { %v127_v37 = vsub.f32 %v113_v34, %v126_v35  ;;  %v129_v38 = vmul.f32 %v128_v36, %v90_v4 }
  0xc2   :  { %v130_v39 = vperm.slane %v127_v37, 0 }
  0xc4   :  { %v131_v40 = vadd.f32 %v130_v39, %v129_v38 }
  0xc6   :  { %v132_v41 = vmul.f32 0.2, %v131_v40 }
  0xc8   :  { %v133_v42 = vmax.f32 %v131_v40, %v132_v41 }
  0xca   :  { %134 = vst [vmem:[#allocation8] sm:$0xff] %v133_v42 }
  0xcb   :  { %145 = dma.vmem_to_hbm [thread:$0]  %s141_s2, 128, %s143_s30, [#allocation4]  }
  0xcc   :  { %272 = dma.done.wait [#allocation4], 128  }
  0xcd   :  { %273 = vsyncadd [#allocation4], 4294967168 }
  0xce   :  { %150 = vsyncpa [#allocation3], 1 }
  0xcf   :  { %151 = vsyncpa [#allocation6], 1 }
  0xd0   :  { %152 = vsyncpa [#allocation4], 1 }

</bundles_post_ra>
